<compile_context>
chip_gen: v7x
topology: tpu7x:2x2x1
jax: 0.10.0
libtpu: 0.0.40
codegen_flags: <defaults>
</compile_context>

<pallas_src>
import jax
import jax.numpy as jnp
from jax.experimental import pallas as pl
from jax.experimental.pallas import tpu as pltpu


def _addhaze_kernel(img_ref, t_ref, out_ref):
    # Works for both block layouts:
    #   img_ref (1, 3, R, 128), t_ref (1, 1, R, 128)   (fast 4-D path)
    #   img_ref (1, 3, TS),     t_ref (1, 1, TS)       (ragged 3-D fallback)
    # t broadcasts across the 3 channels (== torch.cat((t, t, t), dim=1)).
    # (img + 0.5) * t == img * t + 0.5 * t up to one fp rounding step.
    out_ref[...] = (img_ref[...] + 0.5) * t_ref[...]


def _round_up(x: int, m: int) -> int:
    return ((x + m - 1) // m) * m


def _pick_block_rows(r_total: int, n: int, max_rows: int) -> int:
    """Rows-of-128 per block. Must be a multiple of 8 or equal r_total."""
    if r_total <= max_rows:
        if n >= 2 or r_total < 16:
            return r_total  # single spatial block per image
        # N == 1: keep >= 2 spatial blocks so both v7x TensorCores have work.
        return _round_up(-(-r_total // 2), 8)
    return max((max_rows // 8) * 8, 8)


def addhaze(
    img: jax.Array,
    t: jax.Array,
    *,
    max_rows: int = 4096,       # 4-D path: rows of 128 lanes per block (~14 MiB payload/step)
    max_tile_3d: int = 131072,  # 3-D fallback: lanes per block (~3.5 MiB payload/step)
) -> jax.Array:
    """img: (N, 3, H, W) float32, t: (N, 1, H, W) float32 -> (N, 3, H, W)."""
    N, C, H, W = img.shape
    assert C == 3
    assert t.shape == (N, 1, H, W)

    S = H * W

    compiler_params = pltpu.CompilerParams(
        dimension_semantics=("parallel", "parallel"),
        # Large blocks need more scoped VMEM than the 16/32 MiB defaults;
        # 48 MiB is safe on every generation (v7x physical VMEM is 64 MiB).
        vmem_limit_bytes=48 * 1024 * 1024,
    )

    if S % 128 == 0:
        # ---- Fast path: spatial axis as (rows, 128), no sublane padding. ----
        r_total = S // 128
        R = _pick_block_rows(r_total, N, max_rows)

        img_r = img.reshape(N, C, r_total, 128)
        t_r = t.reshape(N, 1, r_total, 128)

        grid = (pl.cdiv(r_total, R), N)  # spatial tiles leading: better v7x balance for small N

        out_r = pl.pallas_call(
            _addhaze_kernel,
            out_shape=jax.ShapeDtypeStruct((N, C, r_total, 128), img.dtype),
            grid=grid,
            in_specs=[
                pl.BlockSpec((1, C, R, 128), lambda s, n: (n, 0, s, 0)),
                pl.BlockSpec((1, 1, R, 128), lambda s, n: (n, 0, s, 0)),
            ],
            out_specs=pl.BlockSpec((1, C, R, 128), lambda s, n: (n, 0, s, 0)),
            compiler_params=compiler_params,
        )(img_r, t_r)

        return out_r.reshape(N, C, H, W)

    # ---- Ragged fallback: lane-dense flattened spatial axis. ----
    # Blocks (1, C, TS): C=3 rides the sublane axis (padded to 8 in VMEM),
    # but HBM traffic is unchanged and the kernel stays HBM-bound.
    TS = min(max_tile_3d, _round_up(S, 128))
    if N == 1 and TS >= S and S > 128:
        # Keep >= 2 spatial blocks so both v7x TensorCores have work.
        TS = _round_up(-(-S // 2), 128)

    img_f = img.reshape(N, C, S)
    t_f = t.reshape(N, 1, S)

    grid = (pl.cdiv(S, TS), N)

    out_f = pl.pallas_call(
        _addhaze_kernel,
        out_shape=jax.ShapeDtypeStruct((N, C, S), img.dtype),
        grid=grid,
        in_specs=[
            pl.BlockSpec((1, C, TS), lambda s, n: (n, 0, s)),
            pl.BlockSpec((1, 1, TS), lambda s, n: (n, 0, s)),
        ],
        out_specs=pl.BlockSpec((1, C, TS), lambda s, n: (n, 0, s)),
        compiler_params=compiler_params,
    )(img_f, t_f)

    return out_f.reshape(N, C, H, W)


def _reference(img, t):
    T = jnp.concatenate((t, t, t), axis=1)
    return img * T + 0.5 * T


if __name__ == "__main__":
    key = jax.random.PRNGKey(0)
    k1, k2, k3, k4, k5, k6 = jax.random.split(key, 6)

    # 1) Small shape with H*W a multiple of 128 (4-D fast path).
    N, H, W = 2, 16, 16
    img = jax.random.uniform(k1, (N, 3, H, W), dtype=jnp.float32)
    t = jax.random.uniform(k2, (N, 1, H, W), dtype=jnp.float32)
    out = addhaze(img, t)
    jax.block_until_ready(out)
    assert out.shape == (N, 3, H, W)
    assert jnp.allclose(out, _reference(img, t), atol=1e-5, rtol=1e-5)

    # 2) Ragged spatial size (H*W = 420, not a multiple of 128) -> 3-D fallback
    #    with a masked trailing block.
    H2, W2 = 20, 21
    img2 = jax.random.uniform(k3, (N, 3, H2, W2), dtype=jnp.float32)
    t2 = jax.random.uniform(k4, (N, 1, H2, W2), dtype=jnp.float32)
    out2 = addhaze(img2, t2)
    jax.block_until_ready(out2)
    assert out2.shape == (N, 3, H2, W2)
    assert jnp.allclose(out2, _reference(img2, t2), atol=1e-5, rtol=1e-5)

    # 3) N == 1 with H*W a multiple of 128 -> exercises the megacore split
    #    (spatial axis tiled into >= 2 blocks).
    H3, W3 = 32, 128
    img3 = jax.random.uniform(k5, (1, 3, H3, W3), dtype=jnp.float32)
    t3 = jax.random.uniform(k6, (1, 1, H3, W3), dtype=jnp.float32)
    out3 = addhaze(img3, t3)
    jax.block_until_ready(out3)
    assert out3.shape == (1, 3, H3, W3)
    assert jnp.allclose(out3, _reference(img3, t3), atol=1e-5, rtol=1e-5)

    print("KERNEL_OK")
</pallas_src>

<mosaic_0001>
module attributes {stable_mosaic.version = 11 : i64} {
  func.func @_addhaze_kernel(%arg0: i32, %arg1: i32, %arg2: memref<1x3x2x128xf32, #tpu.memory_space<vmem>>, %arg3: memref<1x1x2x128xf32, #tpu.memory_space<vmem>>, %arg4: memref<1x3x2x128xf32, #tpu.memory_space<vmem>>) attributes {dimension_semantics = [#tpu.dimension_semantics<parallel>, #tpu.dimension_semantics<parallel>], iteration_bounds = array<i64: 1, 2>, scalar_prefetch = 0 : i64, scratch_operands = 0 : i64, tpu.core_type = #tpu.core_type<tc>, window_params = [{transform_indices = @transform_0, window_bounds = array<i64: 1, 3, 2, 128>}, {transform_indices = @transform_1, window_bounds = array<i64: 1, 1, 2, 128>}, {transform_indices = @transform_2, window_bounds = array<i64: 1, 3, 2, 128>}]} {
    %c0 = arith.constant 0 : index
    %c0_0 = arith.constant 0 : index
    %c0_1 = arith.constant 0 : index
    %c0_2 = arith.constant 0 : index
    %0 = vector.load %arg2[%c0, %c0_0, %c0_1, %c0_2] : memref<1x3x2x128xf32, #tpu.memory_space<vmem>>, vector<1x3x2x128xf32>
    %cst = arith.constant 5.000000e-01 : f32
    %1 = vector.broadcast %cst : f32 to vector<1x3x2x128xf32>
    %2 = arith.addf %0, %1 : vector<1x3x2x128xf32>
    %c0_3 = arith.constant 0 : index
    %c0_4 = arith.constant 0 : index
    %c0_5 = arith.constant 0 : index
    %c0_6 = arith.constant 0 : index
    %3 = vector.load %arg3[%c0_3, %c0_4, %c0_5, %c0_6] : memref<1x1x2x128xf32, #tpu.memory_space<vmem>>, vector<1x1x2x128xf32>
    %4 = vector.broadcast %3 : vector<1x1x2x128xf32> to vector<1x3x2x128xf32>
    %5 = arith.mulf %2, %4 : vector<1x3x2x128xf32>
    %c0_7 = arith.constant 0 : index
    %c0_8 = arith.constant 0 : index
    %c0_9 = arith.constant 0 : index
    %c0_10 = arith.constant 0 : index
    %6 = vector.load %arg4[%c0_7, %c0_8, %c0_9, %c0_10] : memref<1x3x2x128xf32, #tpu.memory_space<vmem>>, vector<1x3x2x128xf32>
    tpu.vector_store %arg4[%c0_7, %c0_8, %c0_9, %c0_10], %5 {strides = array<i32>} : memref<1x3x2x128xf32, #tpu.memory_space<vmem>>, vector<1x3x2x128xf32>,
    return
  }
  func.func @transform_0(%arg0: i32, %arg1: i32) -> (i32, i32, i32, i32) {
    %c0_i32 = arith.constant 0 : i32
    %c0_i32_0 = arith.constant 0 : i32
    %c0_i32_1 = arith.constant 0 : i32
    return %arg1, %c0_i32, %arg0, %c0_i32_0 : i32, i32, i32, i32
  }
  func.func @transform_1(%arg0: i32, %arg1: i32) -> (i32, i32, i32, i32) {
    %c0_i32 = arith.constant 0 : i32
    %c0_i32_0 = arith.constant 0 : i32
    %c0_i32_1 = arith.constant 0 : i32
    return %arg1, %c0_i32, %arg0, %c0_i32_0 : i32, i32, i32, i32
  }
  func.func @transform_2(%arg0: i32, %arg1: i32) -> (i32, i32, i32, i32) {
    %c0_i32 = arith.constant 0 : i32
    %c0_i32_0 = arith.constant 0 : i32
    %c0_i32_1 = arith.constant 0 : i32
    return %arg1, %c0_i32, %arg0, %c0_i32_0 : i32, i32, i32, i32
  }
}

</mosaic_0001>

<bundles_post_ra>
// kernel: tpu_custom_call.1
= control target key start
LH: loop header
LB: loop body
LE: loop exit
PB: predicated region body
PF: predicated region fallthrough
CT: control target
= control target key end

     0   :  { %7 = vsyncpa [#allocation3], 0  ;;  %s830_s0 = inlined_call_operand.hbm [shape: f32[2,3,2,128], index: 0, kind: input, shape index: {}]   ;;  %s831_s1 = inlined_call_operand.hbm [shape: f32[2,1,2,128], index: 1, kind: input, shape index: {}]   ;;  %s832_s2 = inlined_call_operand.hbm [shape: f32[2,3,2,128], index: 2, kind: output, shape index: {}]  }
   0x1   :  { %9 = vsyncpa [#allocation3 + $0x1], 0 }
   0x2   :  { %10 = vsyncpa [#allocation6], 0 }
   0x3   :  { %12 = vsyncpa [#allocation6 + $0x1], 0 }
   0x4   :  { %13 = vsyncpa [#allocation4], 0 }
   0x5   :  { %15 = vsyncpa [#allocation4 + $0x1], 0  ;;  %s613_s9 = smov 0   ;;  %s615_s10 = smov 0  }
   0x6   :  { %s617_s11 = smov 0   ;;  %s619_s12 = smov 0  }
   0x7   :  { %s621_s13 = smov 0   ;;  %s623_s14 = smov 0  }
   0x8 LB: > { %s356_s15 = sadd.s32 4294967295, %s589_s14   ;;  %s357_s16 = sadd.s32 4294967294, %s589_s14   ;;  %s589_s14 = sphi %s623_s14, %s21_s14   ;;  %s585_s13 = sphi %s621_s13, %s851_s13   ;;  %s581_s12 = sphi %s619_s12, %s850_s12   ;;  %s577_s11 = sphi %s617_s11, %s849_s11   ;;  %s573_s10 = sphi %s615_s10, %s848_s10   ;;  %s569_s9 = sphi %s613_s9, %s847_s9  }
   0x9   : > { %s30_s17 = sadd.s32 1, %s585_s13  ;;  %s42_s18 = sadd.s32 1, %s577_s11 }
   0xa   : > { %p31_p0 = scmp.ge.s32.totalorder %s30_s17, 2  ;;  %p49_p1 = scmp.ne.s32.totalorder %s577_s11, %s573_s10 }
   0xb   : > { %p50_p2 = scmp.eq.s32.totalorder %s589_s14, 0  ;;  %p55_p3 = scmp.ne.s32.totalorder %s573_s10, %s569_s9 }
   0xc   : > { %s853_s17 = smov (%p31_p0, %s30_s17), 0  ;;  %p56_p5 = scmp.eq.s32.totalorder %s356_s15, 0 }
   0xd   : > { %p654_p4 = por %p50_p2, %p49_p1  ;;  %s37_s20 = ssub.s32 %s585_s13, %s853_s17 }
   0xe   : > { %p109_p6 = scmp.eq.s32.totalorder %s356_s15, 1  ;;  %p40_p7 = scmp.eq.s32.totalorder %s37_s20, 0 }
   0xf   : > { %p660_p8 = por %p56_p5, %p55_p3  ;;  %p115_p10 = scmp.eq.s32.totalorder %s357_s16, 1 }
  0x10   : > { %p664_p9 = por %p109_p6, %p49_p1  ;;  %p389_p13 = scmp.lt.s32.totalorder %s589_s14, 2 }
  0x11   : > { %s836_s21 = scalar_select %p660_p8, 1, 0 }
  0x12   : > { %s837_s22 = scalar_select %p664_p9, 1, 0 }
  0x13   : > { %s669_s23 = scalar_select %p40_p7, %s577_s11, %s42_s18  }
  0x14   : > { %p671_p11 = por %p115_p10, %p55_p3  ;;  %s678_s25 = sand.u32 1, %s577_s11  }
  0x15   : > { %s368_s26 = smul.u32 6, %s678_s25  ;;  %p684_p0 = pnand %p389_p13, %p654_p4 }
  0x16   : > { %s838_s24 = scalar_select %p671_p11, 1, 0 }
  0x17   : > { %s369_s27 = smul.u32 96, %s585_s13  ;;  %s139_s4 = scalar_lea.vmem [#allocation2], %s368_s26 }
  0x18   : > { %s147_s5 = sshll.u32 %s139_s4, 4  ;;  %s136_s6 = scalar_lea.sflag [#allocation3], %s678_s25  ;;  %s693_s5 = int_to_ptr.vmem [resolvable:$true] %s147_s5 }
  0x19   : > { %s691_s3 = scalar_lea.hbm %s830_s0, %s369_s27  ;;  %p445_p3 = pneg %p684_p0 }
  0x1a   : > { %s443_s7 = scalar_lea.hbm %s691_s3, 96  ;;  %s448_s16 = scalar_lea.hbm %s830_s0, 192 }
  0x1b   : > { %p444_p2 = scmp.ne.s32.totalorder %s691_s3, %s443_s7  ;;  %p449_p6 = scmp.lt.u32.totalorder %s691_s3, %s830_s0 }
  0x1c   : > { %p450_p7 = scmp.lt.u32.totalorder %s448_s16, %s443_s7  ;;  %p452_p13 = scmp.lt.u32.totalorder %s443_s7, %s691_s3 }
  0x1d   : > { %p446_p4 = pnand %p445_p3, %p444_p2 }
  0x1e   : > { %p451_p10 = por %p450_p7, %p449_p6 }
  0x1f   : > { %p447_p5 = pneg %p446_p4 }
  0x20   : > { %p453_p12 = por %p452_p13, %p451_p10 }
  0x22   : > { %p454_p1 = pnand %p453_p12, %p447_p5 }
  0x24   : > { %457 = shalt.err (!%p454_p1)
}
  0x25   : > { %s458_s20 = scalar_lea.vmem %s693_s5, 96  ;;  %s591_s26 = smov [#allocation2]  }
  0x26   : > { %p459_p2 = scmp.ne.s32.totalorder %s693_s5, %s458_s20  ;;  %s463_s27 = sshll.u32 %s591_s26, 4  ;;  %s464_s27 = int_to_ptr.vmem [resolvable:$false] %s463_s27 }
  0x27   : > { %s465_s29 = scalar_lea.vmem %s464_s27, 192  ;;  %p466_p9 = scmp.lt.s32.totalorder %s693_s5, %s464_s27 }
  0x28   : > { %p461_p4 = pnand %p459_p2, %p445_p3  ;;  %p467_p6 = scmp.lt.s32.totalorder %s465_s29, %s458_s20 }
  0x2a   : > { %p462_p11 = pneg %p461_p4  ;;  %p468_p7 = por %p467_p6, %p466_p9 }
  0x2c   : > { %p469_p10 = pnand %p468_p7, %p462_p11 }
  0x2e   : > { %472 = shalt.err (!%p469_p10)
}
  0x2f   : > { %s592_s30 = smov 32   ;;  %s593_s4 = smov 2  }
  0x30   : > { %381 = dma.hbm_to_vmem [thread:$0]  (!%p684_p0), %s691_s3, 96, %s693_s5, %s136_s6, %s592_s30, %s592_s30, %s593_s4  }
  0x31   : > { %p174_p12 = scmp.lt.s32.totalorder %s589_s14, 3  ;;  %s361_s7 = sshll.u32 %s678_s25, 1 }
  0x32   : > { %s362_s8 = sshll.u32 %s585_s13, 5  ;;  %p840_p9 = scmp.ge.s32.totalorder %s589_s14, 1 }
  0x33   : > { %s736_s19 = scalar_lea.hbm %s831_s1, %s362_s8  ;;  %s161_s20 = scalar_lea.vmem [#allocation5], %s361_s7 }
  0x34   : > { %p729_p11 = pnand %p840_p9, %p174_p12  ;;  %s169_s26 = sshll.u32 %s161_s20, 4  ;;  %s170_s26 = int_to_ptr.vmem [resolvable:$true] %s169_s26 }
  0x35   : > { %s158_s3 = scalar_lea.sflag [#allocation6], %s678_s25  ;;  %s473_s5 = scalar_lea.hbm %s736_s19, 32 }
  0x36   : > { %s841_s15 = scalar_select %p729_p11, 1, 0 }
  0x37   : > { %p474_p1 = scmp.ne.s32.totalorder %s736_s19, %s473_s5  ;;  %s478_s29 = scalar_lea.hbm %s831_s1, 64 }
  0x38   : > { %p479_p2 = scmp.lt.u32.totalorder %s736_s19, %s831_s1  ;;  %p480_p4 = scmp.lt.u32.totalorder %s478_s29, %s473_s5 }
  0x39   : > { %p476_p5 = pnand %p474_p1, %p445_p3  ;;  %p482_p7 = scmp.lt.u32.totalorder %s473_s5, %s736_s19 }
  0x3a   : > { %p481_p6 = por %p480_p4, %p479_p2 }
  0x3b   : > { %p477_p13 = pneg %p476_p5 }
  0x3c   : > { %p483_p10 = por %p482_p7, %p481_p6 }
  0x3e   : > { %p484_p12 = pnand %p483_p10, %p477_p13 }
  0x40   : > { %487 = shalt.err (!%p484_p12)
}
  0x41   : > { %s488_s25 = scalar_lea.vmem %s170_s26, 32  ;;  %s594_s7 = smov [#allocation5]  }
  0x42   : > { %p489_p9 = scmp.ne.s32.totalorder %s170_s26, %s488_s25  ;;  %s493_s8 = sshll.u32 %s594_s7, 4  ;;  %s494_s8 = int_to_ptr.vmem [resolvable:$false] %s493_s8 }
  0x43   : > { %s495_s16 = scalar_lea.vmem %s494_s8, 64  ;;  %p496_p8 = scmp.lt.s32.totalorder %s170_s26, %s494_s8 }
  0x44   : > { %p491_p1 = pnand %p489_p9, %p445_p3  ;;  %p497_p11 = scmp.lt.s32.totalorder %s495_s16, %s488_s25 }
  0x46   : > { %p492_p5 = pneg %p491_p1  ;;  %p498_p2 = por %p497_p11, %p496_p8 }
  0x48   : > { %p499_p4 = pnand %p498_p2, %p492_p5 }
  0x4a   : > { %502 = shalt.err (!%p499_p4)
}
  0x4b   : > { %384 = dma.hbm_to_vmem [thread:$0]  (!%p684_p0), %s736_s19, 32, %s170_s26, %s158_s3  }
  0x4c   : > { %p842_p13 = scmp.ne.s32.totalorder %s841_s15, 0 }
  0x4d   : > { %s761_s18 = sand.u32 (!%p842_p13), 1, %s573_s10   ;;  %p843_p3 = scmp.ne.s32.totalorder (!%p842_p13), %s836_s21, 0 }
  0x4e   : > { %178 = sbr.rel (%p842_p13) target bundleno = 116 (0x74), region = 28  ;;  %s181_s5 = scalar_lea.sflag (!%p842_p13), [#allocation3], %s761_s18 }
  0x4f   : > { %s370_s20 = smul.u32 (!%p842_p13), 6, %s761_s18 }
  0x51   : > { %s184_s6 = scalar_lea.vmem (!%p842_p13), [#allocation2], %s370_s20 }
  0x55   : > { %556 = dma.done.wait (%p843_p3), %s181_s5, 96  }
  0x56   : > { %558 = vsyncadd (%p843_p3), %s181_s5, 4294967200  ;;  %s364_s28 = sshll.u32 %s761_s18, 1  ;;  %s190_s15 = scalar_lea.sflag [#allocation6], %s761_s18 }
  0x57   : > { %s193_s19 = scalar_lea.vmem [#allocation5], %s364_s28 }
  0x58   : > { %560 = dma.done.wait (%p843_p3), %s190_s15, 32  }
  0x59   : > { %562 = vsyncadd (%p843_p3), %s190_s15, 4294967264  ;;  %s218_s26 = scalar_lea.vmem [#allocation7], %s370_s20  ;;  %s371_s27 = smul.u32 96, %s581_s12  ;;  %v219_v0 = vld [vmem:[%s184_s6] sm:$0x3] }
  0x5a   : > { %s247_s3 = sshll.u32 %s218_s26, 4  ;;  %v225_v1 = vld [vmem:[%s193_s19] sm:$0x3]  ;;  %v220_v2 = vld [vmem:[%s184_s6 + $0x2] sm:$0x3]  ;;  %v222_v3 = vadd.f32 0.5, %v219_v0  ;;  %s776_s3 = int_to_ptr.vmem [resolvable:$true] %s247_s3 }
  0x5b   : > { %v223_v4 = vadd.f32 0.5, %v220_v2  ;;  %v221_v5 = vld [vmem:[%s184_s6 + $0x4] sm:$0x3]  ;;  %s781_s12 = scalar_lea.hbm %s832_s2, %s371_s27  ;;  %s233_s30 = scalar_lea.sflag [#allocation4], %s761_s18 }
  0x5c   : > { %v224_v6 = vadd.f32 0.5, %v221_v5  ;;  %v226_v7 = vmul.f32 %v225_v1, %v222_v3  ;;  %s503_s4 = scalar_lea.vmem %s776_s3, 96  ;;  %p844_p0 = scmp.ne.s32.totalorder %s837_s22, 0 }
  0x5d   : > { %v227_v8 = vmul.f32 %v225_v1, %v223_v4  ;;  %p504_p8 = scmp.ne.s32.totalorder %s776_s3, %s503_s4  ;;  %s595_s25 = smov [#allocation7]  }
  0x5e   : > { %v228_v9 = vmul.f32 %v225_v1, %v224_v6  ;;  %229 = vst [vmem:[%s218_s26] sm:$0x3] %v226_v7  ;;  %s507_s7 = sshll.u32 %s595_s25, 4  ;;  %s508_s7 = int_to_ptr.vmem [resolvable:$false] %s507_s7 }
  0x5f   : > { %230 = vst [vmem:[%s218_s26 + $0x2] sm:$0x3] %v227_v8  ;;  %p505_p11 = pnand %p504_p8, %p844_p0  ;;  %s509_s8 = scalar_lea.vmem %s508_s7, 192 }
  0x60   : > { %231 = vst [vmem:[%s218_s26 + $0x4] sm:$0x3] %v228_v9  ;;  %p510_p7 = scmp.lt.s32.totalorder %s776_s3, %s508_s7  ;;  %p511_p10 = scmp.lt.s32.totalorder %s509_s8, %s503_s4 }
  0x61   : > { %p506_p6 = pneg %p505_p11 }
  0x62   : > { %p512_p12 = por %p511_p10, %p510_p7 }
  0x64   : > { %p513_p9 = pnand %p512_p12, %p506_p6 }
  0x66   : > { %516 = shalt.err (!%p513_p9)
}
  0x67   : > { %s517_s16 = scalar_lea.hbm %s781_s12, 96  ;;  %s521_s6 = scalar_lea.hbm %s832_s2, 192 }
  0x68   : > { %p518_p1 = scmp.ne.s32.totalorder %s781_s12, %s517_s16  ;;  %p522_p4 = scmp.lt.u32.totalorder %s781_s12, %s832_s2 }
  0x69   : > { %p523_p13 = scmp.lt.u32.totalorder %s521_s6, %s517_s16  ;;  %p525_p8 = scmp.lt.u32.totalorder %s517_s16, %s781_s12 }
  0x6a   : > { %p519_p5 = pnand %p518_p1, %p844_p0 }
  0x6b   : > { %p524_p3 = por %p523_p13, %p522_p4 }
  0x6c   : > { %p520_p2 = pneg %p519_p5 }
  0x6d   : > { %p526_p11 = por %p525_p8, %p524_p3 }
  0x6f   : > { %p527_p6 = pnand %p526_p11, %p520_p2 }
  0x71   : > { %530 = shalt.err (!%p527_p6)
}
  0x72   : > { %s596_s19 = smov 32   ;;  %s597_s26 = smov 2  }
  0x73   : > { %376 = dma.vmem_to_hbm [thread:$0]  (%p844_p0), %s776_s3, 96, %s781_s12, %s233_s30, %s596_s19, %s596_s19, %s597_s26  }
  0x74 PF: > { %s262_s27 = sand.u32 1, %s569_s9   ;;  %p845_p7 = scmp.ne.s32.totalorder %s838_s24, 0 }
  0x75   : > { %p846_p10 = scmp.ge.s32.totalorder %s589_s14, 2  ;;  %s263_s21 = scalar_lea.sflag [#allocation4], %s262_s27 }
  0x77   : > { %p386_p12 = pnand %p846_p10, %p845_p7 }
  0x79   : > { %564 = dma.done.wait (!%p386_p12), %s263_s21, 96  }
  0x7a   : > { %566 = vsyncadd (!%p386_p12), %s263_s21, 4294967200  ;;  %s21_s14 = sadd.s32 1, %s589_s14   ;;  %s847_s9 = smov %s573_s10 }
  0x7b   : > { %p18_p9 = scmp.ge.s32.totalorder %s21_s14, 4   ;;  %s848_s10 = smov %s577_s11 }
  0x7c   : > { %s849_s11 = smov %s669_s23  ;;  %s850_s12 = smov %s585_s13 }
  0x7d   : > { %s851_s13 = smov %s853_s17  ;;  %20 = sbr.rel (!%p18_p9) target bundleno = 8 (0x8), region = 86 }
  0x84   :  { %268 = vsyncpa [#allocation3], 1 }
  0x85   :  { %270 = vsyncpa [#allocation3 + $0x1], 1 }
  0x86   :  { %271 = vsyncpa [#allocation6], 1 }
  0x87   :  { %273 = vsyncpa [#allocation6 + $0x1], 1 }
  0x88   :  { %274 = vsyncpa [#allocation4], 1 }
  0x89   :  { %276 = vsyncpa [#allocation4 + $0x1], 1 }

</bundles_post_ra>
